<compile_context>
chip_gen: v6e
topology: v6e:2x2x1
jax: 0.10.0
libtpu: 0.0.40
codegen_flags: <defaults>
</compile_context>

<pallas_src>
import math

import jax
import jax.numpy as jnp
from jax.experimental import pallas as pl
from jax.experimental.pallas import tpu as pltpu

# ---- small synthetic config (same structure as distilbert-base-uncased) ----
VOCAB = 50        # distilbert: 30522
MAX_POS = 16      # distilbert: 512
HIDDEN = 32       # distilbert: 768
N_HEADS = 4       # distilbert: 12
HEAD_DIM = HIDDEN // N_HEADS
FFN_DIM = 64      # distilbert: 3072
N_LAYERS = 2      # distilbert: 6
N_CLASSES = 2
CLS_PAD = 128     # lane-dense classifier output width (sliced back to 2)
LN_EPS = 1e-12
MASK_NEG = -1e9   # additive mask bias for masked-out keys


def _vmem():
    # whole-array-in-VMEM spec (no grid; shapes here are tiny)
    return pl.BlockSpec(memory_space=pltpu.MemorySpace.VMEM)


def _w_spec(arr):
    # full-extent block for a weight array replicated across the batch grid
    shape = arr.shape
    return pl.BlockSpec(shape, lambda b: (0,) * len(shape))


def _ln(x, g, b):
    # in-kernel LayerNorm helper (f32 VPU math)
    mu = jnp.mean(x, axis=-1, keepdims=True)
    xc = x - mu
    var = jnp.mean(xc * xc, axis=-1, keepdims=True)
    return xc * jax.lax.rsqrt(var + LN_EPS) * g + b


# ----------------------------- Pallas kernels -----------------------------

def _layernorm_kernel(x_ref, g_ref, b_ref, o_ref):
    x = x_ref[...].astype(jnp.float32)
    o_ref[...] = _ln(x, g_ref[...], b_ref[...]).astype(o_ref.dtype)


def layernorm(x, g, b):
    # x: (M, H), g/b: (1, H)
    return pl.pallas_call(
        _layernorm_kernel,
        out_shape=jax.ShapeDtypeStruct(x.shape, x.dtype),
        in_specs=[_vmem(), _vmem(), _vmem()],
        out_specs=_vmem(),
    )(x, g, b)


def _block_kernel(x_ref, bias_ref,
                  wqkv_ref, bqkv_ref, wo_ref, bo_ref, ln1g_ref, ln1b_ref,
                  w1_ref, b1_ref, w2_ref, b2_ref, ln2g_ref, ln2b_ref,
                  o_ref):
    # Fused transformer block for one batch element.
    # x_ref: (S, H); bias_ref: (1, S) additive attention-mask bias.
    x = x_ref[...].astype(jnp.float32)                    # (S, H)
    bias = bias_ref[...]                                  # (1, S)

    # --- fused QKV projection (q already scaled by 1/sqrt(dh) via folded W) ---
    qkv = jnp.dot(x, wqkv_ref[...],
                  preferred_element_type=jnp.float32) + bqkv_ref[...]  # (S, 3H)

    # --- multi-head attention via static lane slices (no transposes) ---
    ctx_heads = []
    for h in range(N_HEADS):
        lo = h * HEAD_DIM
        q_h = qkv[:, lo:lo + HEAD_DIM]                                  # (S, dh)
        k_h = qkv[:, HIDDEN + lo:HIDDEN + lo + HEAD_DIM]                # (S, dh)
        v_h = qkv[:, 2 * HIDDEN + lo:2 * HIDDEN + lo + HEAD_DIM]        # (S, dh)
        # scores: contract over dh without an explicit transpose
        s = jax.lax.dot_general(q_h, k_h, (((1,), (1,)), ((), ())),
                                preferred_element_type=jnp.float32)     # (S, S)
        s = s + bias                                                    # mask
        s = s - jnp.max(s, axis=-1, keepdims=True)
        p = jnp.exp(s)
        p = p * pl.reciprocal(jnp.sum(p, axis=-1, keepdims=True), approx=True)
        ctx_heads.append(jnp.dot(p, v_h, preferred_element_type=jnp.float32))
    ctx = jnp.concatenate(ctx_heads, axis=-1)                           # (S, H)

    # --- output projection + residual + LayerNorm (fused) ---
    sa = jnp.dot(ctx, wo_ref[...],
                 preferred_element_type=jnp.float32) + bo_ref[...]
    h1 = _ln(sa + x, ln1g_ref[...], ln1b_ref[...])

    # --- FFN + residual + LayerNorm (fused) ---
    ff = jnp.dot(h1, w1_ref[...],
                 preferred_element_type=jnp.float32) + b1_ref[...]
    # TODO(synk): HF DistilBERT uses exact erf-GELU; tanh approximation here.
    ff = jax.nn.gelu(ff, approximate=True)
    ff = jnp.dot(ff, w2_ref[...],
                 preferred_element_type=jnp.float32) + b2_ref[...]
    o_ref[...] = _ln(ff + h1, ln2g_ref[...], ln2b_ref[...]).astype(o_ref.dtype)


def transformer_block(x, bias, lyr):
    # x: (B, S, H); bias: (B, 1, S) additive mask bias
    B, S, H = x.shape
    weights = (lyr["wqkv"], lyr["bqkv"], lyr["wo"], lyr["bo"],
               lyr["ln1_g"], lyr["ln1_b"], lyr["w1"], lyr["b1"],
               lyr["w2"], lyr["b2"], lyr["ln2_g"], lyr["ln2_b"])
    act_spec = pl.BlockSpec((pl.Squeezed(), S, H), lambda b: (b, 0, 0))
    bias_spec = pl.BlockSpec((pl.Squeezed(), 1, S), lambda b: (b, 0, 0))
    return pl.pallas_call(
        _block_kernel,
        out_shape=jax.ShapeDtypeStruct((B, S, H), x.dtype),
        grid=(B,),
        in_specs=[act_spec, bias_spec] + [_w_spec(w) for w in weights],
        out_specs=act_spec,
        compiler_params=pltpu.CompilerParams(
            dimension_semantics=("parallel",)),
    )(x, bias, *weights)


def _head_kernel(x_ref, w1_ref, b1_ref, w2_ref, b2_ref, o_ref):
    # pre_classifier -> tanh -> dropout(0.1)=identity at eval -> classifier
    h = jnp.dot(x_ref[...], w1_ref[...],
                preferred_element_type=jnp.float32) + b1_ref[...]
    h = jnp.tanh(h)
    o_ref[...] = (jnp.dot(h, w2_ref[...],
                          preferred_element_type=jnp.float32)
                  + b2_ref[...]).astype(o_ref.dtype)


def classifier_head(pooled, w1, b1, w2_pad, b2_pad):
    # classifier weights are pre-padded to CLS_PAD lanes (lane-dense store);
    # caller slices back to N_CLASSES.
    B = pooled.shape[0]
    out = pl.pallas_call(
        _head_kernel,
        out_shape=jax.ShapeDtypeStruct((B, CLS_PAD), pooled.dtype),
        in_specs=[_vmem()] * 5,
        out_specs=_vmem(),
    )(pooled, w1, b1, w2_pad, b2_pad)
    return out[:, :N_CLASSES]


# ------------------------- parameters (deterministic) -------------------------

def init_params(key):
    keys = iter(jax.random.split(key, 4 + 6 * N_LAYERS))

    def dense(fan_in, fan_out):
        w = jax.random.normal(next(keys), (fan_in, fan_out), jnp.float32) * 0.02
        b = jnp.zeros((1, fan_out), jnp.float32)
        return w, b

    def ln():
        return (jnp.ones((1, HIDDEN), jnp.float32),
                jnp.zeros((1, HIDDEN), jnp.float32))

    scale = 1.0 / math.sqrt(HEAD_DIM)

    params = {
        "word_emb": jax.random.normal(next(keys), (VOCAB, HIDDEN),
                                      jnp.float32) * 0.02,
        "pos_emb": jax.random.normal(next(keys), (MAX_POS, HIDDEN),
                                     jnp.float32) * 0.02,
        "layers": [],
    }
    params["emb_ln_g"], params["emb_ln_b"] = ln()

    for _ in range(N_LAYERS):
        wq, bq = dense(HIDDEN, HIDDEN)
        wk, bk = dense(HIDDEN, HIDDEN)
        wv, bv = dense(HIDDEN, HIDDEN)
        wo, bo = dense(HIDDEN, HIDDEN)
        w1, b1 = dense(HIDDEN, FFN_DIM)
        w2, b2 = dense(FFN_DIM, HIDDEN)
        ln1_g, ln1_b = ln()
        ln2_g, ln2_b = ln()
        params["layers"].append({
            # fused QKV with 1/sqrt(dh) folded into the Q slice
            "wqkv": jnp.concatenate([wq * scale, wk, wv], axis=1),
            "bqkv": jnp.concatenate([bq * scale, bk, bv], axis=1),
            "wo": wo, "bo": bo,
            "ln1_g": ln1_g, "ln1_b": ln1_b,
            "w1": w1, "b1": b1, "w2": w2, "b2": b2,
            "ln2_g": ln2_g, "ln2_b": ln2_b,
        })

    params["pre_classifier_w"], params["pre_classifier_b"] = dense(HIDDEN, HIDDEN)
    wc, bc = dense(HIDDEN, N_CLASSES)
    params["classifier_w_pad"] = jnp.zeros((HIDDEN, CLS_PAD),
                                           jnp.float32).at[:, :N_CLASSES].set(wc)
    params["classifier_b_pad"] = jnp.zeros((1, CLS_PAD),
                                           jnp.float32).at[:, :N_CLASSES].set(bc)
    return params


# ------------------------------- forward pass -------------------------------

def distilbert_class_forward(params, input_ids, attention_mask, token_type_ids):
    # token_type_ids accepted for signature parity but unused: DistilBERT has
    # no token-type embeddings (the HF model ignores them).
    del token_type_ids
    B, S = input_ids.shape

    # embeddings: word + position gather (JAX glue), then LayerNorm kernel
    x = (params["word_emb"][input_ids]
         + params["pos_emb"][jnp.arange(S)][None, :, :])
    x = layernorm(x.reshape(B * S, HIDDEN),
                  params["emb_ln_g"], params["emb_ln_b"]).reshape(B, S, HIDDEN)

    # additive attention-mask bias, computed once per forward
    bias = jnp.where(attention_mask > 0, 0.0, MASK_NEG).astype(
        jnp.float32).reshape(B, 1, S)

    for lyr in params["layers"]:
        x = transformer_block(x, bias, lyr)

    pooled = x[:, 0]  # (B, HIDDEN): hidden_state[:, 0] ([CLS] token)
    logits = classifier_head(pooled,
                             params["pre_classifier_w"],
                             params["pre_classifier_b"],
                             params["classifier_w_pad"],
                             params["classifier_b_pad"])
    return logits


if __name__ == "__main__":
    key = jax.random.PRNGKey(0)
    pkey, ikey = jax.random.split(key)
    params = init_params(pkey)

    B, S = 2, 8
    input_ids = jax.random.randint(ikey, (B, S), 0, VOCAB, dtype=jnp.int32)
    attention_mask = jnp.ones((B, S), jnp.float32)
    token_type_ids = jnp.zeros((B, S), jnp.int32)

    fwd = jax.jit(distilbert_class_forward)
    logits = fwd(params, input_ids, attention_mask, token_type_ids)
    jax.block_until_ready(logits)
    assert logits.shape == (B, N_CLASSES) and logits.dtype == jnp.float32
    print("KERNEL_OK")
</pallas_src>

<mosaic_0001>
module attributes {stable_mosaic.version = 11 : i64} {
  func.func @_head_kernel(%arg0: memref<2x32xf32, #tpu.memory_space<vmem>>, %arg1: memref<32x32xf32, #tpu.memory_space<vmem>>, %arg2: memref<1x32xf32, #tpu.memory_space<vmem>>, %arg3: memref<32x128xf32, #tpu.memory_space<vmem>>, %arg4: memref<1x128xf32, #tpu.memory_space<vmem>>, %arg5: memref<2x128xf32, #tpu.memory_space<vmem>>) attributes {dimension_semantics = [], scalar_prefetch = 0 : i64, scratch_operands = 0 : i64, tpu.core_type = #tpu.core_type<tc>} {
    %c0 = arith.constant 0 : index
    %c0_0 = arith.constant 0 : index
    %0 = vector.load %arg0[%c0, %c0_0] : memref<2x32xf32, #tpu.memory_space<vmem>>, vector<2x32xf32>
    %c0_1 = arith.constant 0 : index
    %c0_2 = arith.constant 0 : index
    %1 = vector.load %arg1[%c0_1, %c0_2] : memref<32x32xf32, #tpu.memory_space<vmem>>, vector<32x32xf32>
    %cst = arith.constant dense<0.000000e+00> : vector<2x32xf32>
    %2 = tpu.matmul %0, %1, %cst {dimension_numbers = #tpu.dot_dimension_numbers<[1], [0], [0], [1], [0, 0, 1, 1], [], []>} : vector<2x32xf32>, vector<32x32xf32>, vector<2x32xf32> -> vector<2x32xf32>
    %c0_3 = arith.constant 0 : index
    %c0_4 = arith.constant 0 : index
    %3 = vector.load %arg2[%c0_3, %c0_4] : memref<1x32xf32, #tpu.memory_space<vmem>>, vector<1x32xf32>
    %4 = vector.broadcast %3 : vector<1x32xf32> to vector<2x32xf32>
    %5 = arith.addf %2, %4 : vector<2x32xf32>
    %6 = math.tanh %5 : vector<2x32xf32>
    %c0_5 = arith.constant 0 : index
    %c0_6 = arith.constant 0 : index
    %7 = vector.load %arg3[%c0_5, %c0_6] : memref<32x128xf32, #tpu.memory_space<vmem>>, vector<32x128xf32>
    %cst_7 = arith.constant dense<0.000000e+00> : vector<2x128xf32>
    %8 = tpu.matmul %6, %7, %cst_7 {dimension_numbers = #tpu.dot_dimension_numbers<[1], [0], [0], [1], [0, 0, 1, 1], [], []>} : vector<2x32xf32>, vector<32x128xf32>, vector<2x128xf32> -> vector<2x128xf32>
    %c0_8 = arith.constant 0 : index
    %c0_9 = arith.constant 0 : index
    %9 = vector.load %arg4[%c0_8, %c0_9] : memref<1x128xf32, #tpu.memory_space<vmem>>, vector<1x128xf32>
    %10 = vector.broadcast %9 : vector<1x128xf32> to vector<2x128xf32>
    %11 = arith.addf %8, %10 : vector<2x128xf32>
    %c0_10 = arith.constant 0 : index
    %c0_11 = arith.constant 0 : index
    %12 = vector.load %arg5[%c0_10, %c0_11] : memref<2x128xf32, #tpu.memory_space<vmem>>, vector<2x128xf32>
    tpu.vector_store %arg5[%c0_10, %c0_11], %11 {strides = array<i32>} : memref<2x128xf32, #tpu.memory_space<vmem>>, vector<2x128xf32>,
    return
  }
}

module attributes {stable_mosaic.version = 11 : i64} {
  func.func @_layernorm_kernel(%arg0: memref<16x32xf32, #tpu.memory_space<vmem>>, %arg1: memref<1x32xf32, #tpu.memory_space<vmem>>, %arg2: memref<1x32xf32, #tpu.memory_space<vmem>>, %arg3: memref<16x32xf32, #tpu.memory_space<vmem>>) attributes {dimension_semantics = [], scalar_prefetch = 0 : i64, scratch_operands = 0 : i64, tpu.core_type = #tpu.core_type<tc>} {
    %c0 = arith.constant 0 : index
    %c0_0 = arith.constant 0 : index
    %0 = vector.load %arg0[%c0, %c0_0] : memref<16x32xf32, #tpu.memory_space<vmem>>, vector<16x32xf32>
    %c0_1 = arith.constant 0 : index
    %c0_2 = arith.constant 0 : index
    %1 = vector.load %arg1[%c0_1, %c0_2] : memref<1x32xf32, #tpu.memory_space<vmem>>, vector<1x32xf32>
    %c0_3 = arith.constant 0 : index
    %c0_4 = arith.constant 0 : index
    %2 = vector.load %arg2[%c0_3, %c0_4] : memref<1x32xf32, #tpu.memory_space<vmem>>, vector<1x32xf32>
    %cst = arith.constant dense<0.000000e+00> : vector<16xf32>
    %3 = vector.multi_reduction <add>, %0, %cst [1] : vector<16x32xf32> to vector<16xf32>
    %4 = vector.shape_cast %3 : vector<16xf32> to vector<16x1xf32>
    %cst_5 = arith.constant 3.200000e+01 : f32
    %5 = vector.broadcast %cst_5 : f32 to vector<16x1xf32>
    %6 = arith.divf %4, %5 : vector<16x1xf32>
    %7 = vector.broadcast %6 : vector<16x1xf32> to vector<16x32xf32>
    %8 = arith.subf %0, %7 : vector<16x32xf32>
    %9 = arith.mulf %8, %8 : vector<16x32xf32>
    %cst_6 = arith.constant dense<0.000000e+00> : vector<16xf32>
    %10 = vector.multi_reduction <add>, %9, %cst_6 [1] : vector<16x32xf32> to vector<16xf32>
    %11 = vector.shape_cast %10 : vector<16xf32> to vector<16x1xf32>
    %cst_7 = arith.constant 3.200000e+01 : f32
    %12 = vector.broadcast %cst_7 : f32 to vector<16x1xf32>
    %13 = arith.divf %11, %12 : vector<16x1xf32>
    %cst_8 = arith.constant 9.99999996E-13 : f32
    %14 = vector.broadcast %cst_8 : f32 to vector<16x1xf32>
    %15 = arith.addf %13, %14 : vector<16x1xf32>
    %16 = math.rsqrt %15 : vector<16x1xf32>
    %17 = vector.broadcast %16 : vector<16x1xf32> to vector<16x32xf32>
    %18 = arith.mulf %8, %17 : vector<16x32xf32>
    %19 = vector.broadcast %1 : vector<1x32xf32> to vector<16x32xf32>
    %20 = arith.mulf %18, %19 : vector<16x32xf32>
    %21 = vector.broadcast %2 : vector<1x32xf32> to vector<16x32xf32>
    %22 = arith.addf %20, %21 : vector<16x32xf32>
    %c0_9 = arith.constant 0 : index
    %c0_10 = arith.constant 0 : index
    %23 = vector.load %arg3[%c0_9, %c0_10] : memref<16x32xf32, #tpu.memory_space<vmem>>, vector<16x32xf32>
    tpu.vector_store %arg3[%c0_9, %c0_10], %22 {strides = array<i32>} : memref<16x32xf32, #tpu.memory_space<vmem>>, vector<16x32xf32>,
    return
  }
}

module attributes {stable_mosaic.version = 11 : i64} {
  func.func @_block_kernel(%arg0: i32, %arg1: memref<1x8x32xf32, #tpu.memory_space<vmem>>, %arg2: memref<1x1x8xf32, #tpu.memory_space<vmem>>, %arg3: memref<32x96xf32, #tpu.memory_space<vmem>>, %arg4: memref<1x96xf32, #tpu.memory_space<vmem>>, %arg5: memref<32x32xf32, #tpu.memory_space<vmem>>, %arg6: memref<1x32xf32, #tpu.memory_space<vmem>>, %arg7: memref<1x32xf32, #tpu.memory_space<vmem>>, %arg8: memref<1x32xf32, #tpu.memory_space<vmem>>, %arg9: memref<32x64xf32, #tpu.memory_space<vmem>>, %arg10: memref<1x64xf32, #tpu.memory_space<vmem>>, %arg11: memref<64x32xf32, #tpu.memory_space<vmem>>, %arg12: memref<1x32xf32, #tpu.memory_space<vmem>>, %arg13: memref<1x32xf32, #tpu.memory_space<vmem>>, %arg14: memref<1x32xf32, #tpu.memory_space<vmem>>, %arg15: memref<1x8x32xf32, #tpu.memory_space<vmem>>) attributes {dimension_semantics = [#tpu.dimension_semantics<parallel>], iteration_bounds = array<i64: 2>, scalar_prefetch = 0 : i64, scratch_operands = 0 : i64, tpu.core_type = #tpu.core_type<tc>, window_params = [{transform_indices = @transform_0, window_bounds = array<i64: 1, 8, 32>}, {transform_indices = @transform_1, window_bounds = array<i64: 1, 1, 8>}, {pipeline_mode = #tpu.pipeline_mode<synchronous>, transform_indices = @transform_2, window_bounds = array<i64: 32, 96>}, {pipeline_mode = #tpu.pipeline_mode<synchronous>, transform_indices = @transform_3, window_bounds = array<i64: 1, 96>}, {pipeline_mode = #tpu.pipeline_mode<synchronous>, transform_indices = @transform_4, window_bounds = array<i64: 32, 32>}, {pipeline_mode = #tpu.pipeline_mode<synchronous>, transform_indices = @transform_5, window_bounds = array<i64: 1, 32>}, {pipeline_mode = #tpu.pipeline_mode<synchronous>, transform_indices = @transform_6, window_bounds = array<i64: 1, 32>}, {pipeline_mode = #tpu.pipeline_mode<synchronous>, transform_indices = @transform_7, window_bounds = array<i64: 1, 32>}, {pipeline_mode = #tpu.pipeline_mode<synchronous>, transform_indices = @transform_8, window_bounds = array<i64: 32, 64>}, {pipeline_mode = #tpu.pipeline_mode<synchronous>, transform_indices = @transform_9, window_bounds = array<i64: 1, 64>}, {pipeline_mode = #tpu.pipeline_mode<synchronous>, transform_indices = @transform_10, window_bounds = array<i64: 64, 32>}, {pipeline_mode = #tpu.pipeline_mode<synchronous>, transform_indices = @transform_11, window_bounds = array<i64: 1, 32>}, {pipeline_mode = #tpu.pipeline_mode<synchronous>, transform_indices = @transform_12, window_bounds = array<i64: 1, 32>}, {pipeline_mode = #tpu.pipeline_mode<synchronous>, transform_indices = @transform_13, window_bounds = array<i64: 1, 32>}, {transform_indices = @transform_14, window_bounds = array<i64: 1, 8, 32>}]} {
    %c0 = arith.constant 0 : index
    %c0_0 = arith.constant 0 : index
    %c0_1 = arith.constant 0 : index
    %0 = vector.load %arg1[%c0, %c0_0, %c0_1] : memref<1x8x32xf32, #tpu.memory_space<vmem>>, vector<1x8x32xf32>
    %1 = vector.shape_cast %0 : vector<1x8x32xf32> to vector<8x32xf32>
    %c0_2 = arith.constant 0 : index
    %c0_3 = arith.constant 0 : index
    %c0_4 = arith.constant 0 : index
    %2 = vector.load %arg2[%c0_2, %c0_3, %c0_4] : memref<1x1x8xf32, #tpu.memory_space<vmem>>, vector<1x1x8xf32>
    %3 = vector.shape_cast %2 : vector<1x1x8xf32> to vector<1x8xf32>
    %c0_5 = arith.constant 0 : index
    %c0_6 = arith.constant 0 : index
    %4 = vector.load %arg3[%c0_5, %c0_6] : memref<32x96xf32, #tpu.memory_space<vmem>>, vector<32x96xf32>
    %cst = arith.constant dense<0.000000e+00> : vector<8x96xf32>
    %5 = tpu.matmul %1, %4, %cst {dimension_numbers = #tpu.dot_dimension_numbers<[1], [0], [0], [1], [0, 0, 1, 1], [], []>} : vector<8x32xf32>, vector<32x96xf32>, vector<8x96xf32> -> vector<8x96xf32>
    %c0_7 = arith.constant 0 : index
    %c0_8 = arith.constant 0 : index
    %6 = vector.load %arg4[%c0_7, %c0_8] : memref<1x96xf32, #tpu.memory_space<vmem>>, vector<1x96xf32>
    %7 = vector.broadcast %6 : vector<1x96xf32> to vector<8x96xf32>
    %8 = arith.addf %5, %7 : vector<8x96xf32>
    %9 = vector.extract_strided_slice %8 {offsets = [0, 0], sizes = [8, 8], strides = [1, 1]} : vector<8x96xf32> to vector<8x8xf32>
    %10 = vector.extract_strided_slice %8 {offsets = [0, 32], sizes = [8, 8], strides = [1, 1]} : vector<8x96xf32> to vector<8x8xf32>
    %11 = vector.extract_strided_slice %8 {offsets = [0, 64], sizes = [8, 8], strides = [1, 1]} : vector<8x96xf32> to vector<8x8xf32>
    %cst_9 = arith.constant dense<0.000000e+00> : vector<8x8xf32>
    %12 = tpu.matmul %9, %10, %cst_9 {dimension_numbers = #tpu.dot_dimension_numbers<[1], [1], [0], [0], [0, 0, 1, 0], [], []>} : vector<8x8xf32>, vector<8x8xf32>, vector<8x8xf32> -> vector<8x8xf32>
    %13 = vector.broadcast %3 : vector<1x8xf32> to vector<8x8xf32>
    %14 = arith.addf %12, %13 : vector<8x8xf32>
    %cst_10 = arith.constant dense<0xFF800000> : vector<8xf32>
    %15 = vector.multi_reduction <maximumf>, %14, %cst_10 [1] : vector<8x8xf32> to vector<8xf32>
    %16 = vector.shape_cast %15 : vector<8xf32> to vector<8x1xf32>
    %17 = vector.broadcast %16 : vector<8x1xf32> to vector<8x8xf32>
    %18 = arith.subf %14, %17 : vector<8x8xf32>
    %19 = math.exp %18 : vector<8x8xf32>
    %cst_11 = arith.constant dense<0.000000e+00> : vector<8xf32>
    %20 = vector.multi_reduction <add>, %19, %cst_11 [1] : vector<8x8xf32> to vector<8xf32>
    %21 = vector.shape_cast %20 : vector<8xf32> to vector<8x1xf32>
    %22 = tpu.reciprocal %21 {approx = true} : vector<8x1xf32> -> vector<8x1xf32>
    %23 = vector.broadcast %22 : vector<8x1xf32> to vector<8x8xf32>
    %24 = arith.mulf %19, %23 : vector<8x8xf32>
    %cst_12 = arith.constant dense<0.000000e+00> : vector<8x8xf32>
    %25 = tpu.matmul %24, %11, %cst_12 {dimension_numbers = #tpu.dot_dimension_numbers<[1], [0], [0], [1], [0, 0, 1, 1], [], []>} : vector<8x8xf32>, vector<8x8xf32>, vector<8x8xf32> -> vector<8x8xf32>
    %26 = vector.extract_strided_slice %8 {offsets = [0, 8], sizes = [8, 8], strides = [1, 1]} : vector<8x96xf32> to vector<8x8xf32>
    %27 = vector.extract_strided_slice %8 {offsets = [0, 40], sizes = [8, 8], strides = [1, 1]} : vector<8x96xf32> to vector<8x8xf32>
    %28 = vector.extract_strided_slice %8 {offsets = [0, 72], sizes = [8, 8], strides = [1, 1]} : vector<8x96xf32> to vector<8x8xf32>
    %cst_13 = arith.constant dense<0.000000e+00> : vector<8x8xf32>
    %29 = tpu.matmul %26, %27, %cst_13 {dimension_numbers = #tpu.dot_dimension_numbers<[1], [1], [0], [0], [0, 0, 1, 0], [], []>} : vector<8x8xf32>, vector<8x8xf32>, vector<8x8xf32> -> vector<8x8xf32>
    %30 = vector.broadcast %3 : vector<1x8xf32> to vector<8x8xf32>
    %31 = arith.addf %29, %30 : vector<8x8xf32>
    %cst_14 = arith.constant dense<0xFF800000> : vector<8xf32>
    %32 = vector.multi_reduction <maximumf>, %31, %cst_14 [1] : vector<8x8xf32> to vector<8xf32>
    %33 = vector.shape_cast %32 : vector<8xf32> to vector<8x1xf32>
    %34 = vector.broadcast %33 : vector<8x1xf32> to vector<8x8xf32>
    %35 = arith.subf %31, %34 : vector<8x8xf32>
    %36 = math.exp %35 : vector<8x8xf32>
    %cst_15 = arith.constant dense<0.000000e+00> : vector<8xf32>
    %37 = vector.multi_reduction <add>, %36, %cst_15 [1] : vector<8x8xf32> to vector<8xf32>
    %38 = vector.shape_cast %37 : vector<8xf32> to vector<8x1xf32>
    %39 = tpu.reciprocal %38 {approx = true} : vector<8x1xf32> -> vector<8x1xf32>
    %40 = vector.broadcast %39 : vector<8x1xf32> to vector<8x8xf32>
    %41 = arith.mulf %36, %40 : vector<8x8xf32>
    %cst_16 = arith.constant dense<0.000000e+00> : vector<8x8xf32>
    %42 = tpu.matmul %41, %28, %cst_16 {dimension_numbers = #tpu.dot_dimension_numbers<[1], [0], [0], [1], [0, 0, 1, 1], [], []>} : vector<8x8xf32>, vector<8x8xf32>, vector<8x8xf32> -> vector<8x8xf32>
    %43 = vector.extract_strided_slice %8 {offsets = [0, 16], sizes = [8, 8], strides = [1, 1]} : vector<8x96xf32> to vector<8x8xf32>
    %44 = vector.extract_strided_slice %8 {offsets = [0, 48], sizes = [8, 8], strides = [1, 1]} : vector<8x96xf32> to vector<8x8xf32>
    %45 = vector.extract_strided_slice %8 {offsets = [0, 80], sizes = [8, 8], strides = [1, 1]} : vector<8x96xf32> to vector<8x8xf32>
    %cst_17 = arith.constant dense<0.000000e+00> : vector<8x8xf32>
    %46 = tpu.matmul %43, %44, %cst_17 {dimension_numbers = #tpu.dot_dimension_numbers<[1], [1], [0], [0], [0, 0, 1, 0], [], []>} : vector<8x8xf32>, vector<8x8xf32>, vector<8x8xf32> -> vector<8x8xf32>
    %47 = vector.broadcast %3 : vector<1x8xf32> to vector<8x8xf32>
    %48 = arith.addf %46, %47 : vector<8x8xf32>
    %cst_18 = arith.constant dense<0xFF800000> : vector<8xf32>
    %49 = vector.multi_reduction <maximumf>, %48, %cst_18 [1] : vector<8x8xf32> to vector<8xf32>
    %50 = vector.shape_cast %49 : vector<8xf32> to vector<8x1xf32>
    %51 = vector.broadcast %50 : vector<8x1xf32> to vector<8x8xf32>
    %52 = arith.subf %48, %51 : vector<8x8xf32>
    %53 = math.exp %52 : vector<8x8xf32>
    %cst_19 = arith.constant dense<0.000000e+00> : vector<8xf32>
    %54 = vector.multi_reduction <add>, %53, %cst_19 [1] : vector<8x8xf32> to vector<8xf32>
    %55 = vector.shape_cast %54 : vector<8xf32> to vector<8x1xf32>
    %56 = tpu.reciprocal %55 {approx = true} : vector<8x1xf32> -> vector<8x1xf32>
    %57 = vector.broadcast %56 : vector<8x1xf32> to vector<8x8xf32>
    %58 = arith.mulf %53, %57 : vector<8x8xf32>
    %cst_20 = arith.constant dense<0.000000e+00> : vector<8x8xf32>
    %59 = tpu.matmul %58, %45, %cst_20 {dimension_numbers = #tpu.dot_dimension_numbers<[1], [0], [0], [1], [0, 0, 1, 1], [], []>} : vector<8x8xf32>, vector<8x8xf32>, vector<8x8xf32> -> vector<8x8xf32>
    %60 = vector.extract_strided_slice %8 {offsets = [0, 24], sizes = [8, 8], strides = [1, 1]} : vector<8x96xf32> to vector<8x8xf32>
    %61 = vector.extract_strided_slice %8 {offsets = [0, 56], sizes = [8, 8], strides = [1, 1]} : vector<8x96xf32> to vector<8x8xf32>
    %62 = vector.extract_strided_slice %8 {offsets = [0, 88], sizes = [8, 8], strides = [1, 1]} : vector<8x96xf32> to vector<8x8xf32>
    %cst_21 = arith.constant dense<0.000000e+00> : vector<8x8xf32>
    %63 = tpu.matmul %60, %61, %cst_21 {dimension_numbers = #tpu.dot_dimension_numbers<[1], [1], [0], [0], [0, 0, 1, 0], [], []>} : vector<8x8xf32>, vector<8x8xf32>, vector<8x8xf32> -> vector<8x8xf32>
    %64 = vector.broadcast %3 : vector<1x8xf32> to vector<8x8xf32>
    %65 = arith.addf %63, %64 : vector<8x8xf32>
    %cst_22 = arith.constant dense<0xFF800000> : vector<8xf32>
    %66 = vector.multi_reduction <maximumf>, %65, %cst_22 [1] : vector<8x8xf32> to vector<8xf32>
    %67 = vector.shape_cast %66 : vector<8xf32> to vector<8x1xf32>
    %68 = vector.broadcast %67 : vector<8x1xf32> to vector<8x8xf32>
    %69 = arith.subf %65, %68 : vector<8x8xf32>
    %70 = math.exp %69 : vector<8x8xf32>
    %cst_23 = arith.constant dense<0.000000e+00> : vector<8xf32>
    %71 = vector.multi_reduction <add>, %70, %cst_23 [1] : vector<8x8xf32> to vector<8xf32>
    %72 = vector.shape_cast %71 : vector<8xf32> to vector<8x1xf32>
    %73 = tpu.reciprocal %72 {approx = true} : vector<8x1xf32> -> vector<8x1xf32>
    %74 = vector.broadcast %73 : vector<8x1xf32> to vector<8x8xf32>
    %75 = arith.mulf %70, %74 : vector<8x8xf32>
    %cst_24 = arith.constant dense<0.000000e+00> : vector<8x8xf32>
    %76 = tpu.matmul %75, %62, %cst_24 {dimension_numbers = #tpu.dot_dimension_numbers<[1], [0], [0], [1], [0, 0, 1, 1], [], []>} : vector<8x8xf32>, vector<8x8xf32>, vector<8x8xf32> -> vector<8x8xf32>
    %77 = tpu.concatenate %25, %42, %59, %76 in 1 : vector<8x8xf32>, vector<8x8xf32>, vector<8x8xf32>, vector<8x8xf32> -> vector<8x32xf32>
    %c0_25 = arith.constant 0 : index
    %c0_26 = arith.constant 0 : index
    %78 = vector.load %arg5[%c0_25, %c0_26] : memref<32x32xf32, #tpu.memory_space<vmem>>, vector<32x32xf32>
    %cst_27 = arith.constant dense<0.000000e+00> : vector<8x32xf32>
    %79 = tpu.matmul %77, %78, %cst_27 {dimension_numbers = #tpu.dot_dimension_numbers<[1], [0], [0], [1], [0, 0, 1, 1], [], []>} : vector<8x32xf32>, vector<32x32xf32>, vector<8x32xf32> -> vector<8x32xf32>
    %c0_28 = arith.constant 0 : index
    %c0_29 = arith.constant 0 : index
    %80 = vector.load %arg6[%c0_28, %c0_29] : memref<1x32xf32, #tpu.memory_space<vmem>>, vector<1x32xf32>
    %81 = vector.broadcast %80 : vector<1x32xf32> to vector<8x32xf32>
    %82 = arith.addf %79, %81 : vector<8x32xf32>
    %83 = arith.addf %82, %1 : vector<8x32xf32>
    %c0_30 = arith.constant 0 : index
    %c0_31 = arith.constant 0 : index
    %84 = vector.load %arg7[%c0_30, %c0_31] : memref<1x32xf32, #tpu.memory_space<vmem>>, vector<1x32xf32>
    %c0_32 = arith.constant 0 : index
    %c0_33 = arith.constant 0 : index
    %85 = vector.load %arg8[%c0_32, %c0_33] : memref<1x32xf32, #tpu.memory_space<vmem>>, vector<1x32xf32>
    %cst_34 = arith.constant dense<0.000000e+00> : vector<8xf32>
    %86 = vector.multi_reduction <add>, %83, %cst_34 [1] : vector<8x32xf32> to vector<8xf32>
    %87 = vector.shape_cast %86 : vector<8xf32> to vector<8x1xf32>
    %cst_35 = arith.constant 3.200000e+01 : f32
    %88 = vector.broadcast %cst_35 : f32 to vector<8x1xf32>
    %89 = arith.divf %87, %88 : vector<8x1xf32>
    %90 = vector.broadcast %89 : vector<8x1xf32> to vector<8x32xf32>
    %91 = arith.subf %83, %90 : vector<8x32xf32>
    %92 = arith.mulf %91, %91 : vector<8x32xf32>
    %cst_36 = arith.constant dense<0.000000e+00> : vector<8xf32>
    %93 = vector.multi_reduction <add>, %92, %cst_36 [1] : vector<8x32xf32> to vector<8xf32>
    %94 = vector.shape_cast %93 : vector<8xf32> to vector<8x1xf32>
    %cst_37 = arith.constant 3.200000e+01 : f32
    %95 = vector.broadcast %cst_37 : f32 to vector<8x1xf32>
    %96 = arith.divf %94, %95 : vector<8x1xf32>
    %cst_38 = arith.constant 9.99999996E-13 : f32
    %97 = vector.broadcast %cst_38 : f32 to vector<8x1xf32>
    %98 = arith.addf %96, %97 : vector<8x1xf32>
    %99 = math.rsqrt %98 : vector<8x1xf32>
    %100 = vector.broadcast %99 : vector<8x1xf32> to vector<8x32xf32>
    %101 = arith.mulf %91, %100 : vector<8x32xf32>
    %102 = vector.broadcast %84 : vector<1x32xf32> to vector<8x32xf32>
    %103 = arith.mulf %101, %102 : vector<8x32xf32>
    %104 = vector.broadcast %85 : vector<1x32xf32> to vector<8x32xf32>
    %105 = arith.addf %103, %104 : vector<8x32xf32>
    %c0_39 = arith.constant 0 : index
    %c0_40 = arith.constant 0 : index
    %106 = vector.load %arg9[%c0_39, %c0_40] : memref<32x64xf32, #tpu.memory_space<vmem>>, vector<32x64xf32>
    %cst_41 = arith.constant dense<0.000000e+00> : vector<8x64xf32>
    %107 = tpu.matmul %105, %106, %cst_41 {dimension_numbers = #tpu.dot_dimension_numbers<[1], [0], [0], [1], [0, 0, 1, 1], [], []>} : vector<8x32xf32>, vector<32x64xf32>, vector<8x64xf32> -> vector<8x64xf32>
    %c0_42 = arith.constant 0 : index
    %c0_43 = arith.constant 0 : index
    %108 = vector.load %arg10[%c0_42, %c0_43] : memref<1x64xf32, #tpu.memory_space<vmem>>, vector<1x64xf32>
    %109 = vector.broadcast %108 : vector<1x64xf32> to vector<8x64xf32>
    %110 = arith.addf %107, %109 : vector<8x64xf32>
    %111 = arith.mulf %110, %110 : vector<8x64xf32>
    %112 = arith.mulf %110, %111 : vector<8x64xf32>
    %cst_44 = arith.constant 4.471500e-02 : f32
    %113 = vector.broadcast %cst_44 : f32 to vector<8x64xf32>
    %114 = arith.mulf %113, %112 : vector<8x64xf32>
    %115 = arith.addf %110, %114 : vector<8x64xf32>
    %cst_45 = arith.constant 0.797884583 : f32
    %116 = vector.broadcast %cst_45 : f32 to vector<8x64xf32>
    %117 = arith.mulf %116, %115 : vector<8x64xf32>
    %118 = math.tanh %117 : vector<8x64xf32>
    %cst_46 = arith.constant 1.000000e+00 : f32
    %119 = vector.broadcast %cst_46 : f32 to vector<8x64xf32>
    %120 = arith.addf %119, %118 : vector<8x64xf32>
    %cst_47 = arith.constant 5.000000e-01 : f32
    %121 = vector.broadcast %cst_47 : f32 to vector<8x64xf32>
    %122 = arith.mulf %121, %120 : vector<8x64xf32>
    %123 = arith.mulf %110, %122 : vector<8x64xf32>
    %c0_48 = arith.constant 0 : index
    %c0_49 = arith.constant 0 : index
    %124 = vector.load %arg11[%c0_48, %c0_49] : memref<64x32xf32, #tpu.memory_space<vmem>>, vector<64x32xf32>
    %cst_50 = arith.constant dense<0.000000e+00> : vector<8x32xf32>
    %125 = tpu.matmul %123, %124, %cst_50 {dimension_numbers = #tpu.dot_dimension_numbers<[1], [0], [0], [1], [0, 0, 1, 1], [], []>} : vector<8x64xf32>, vector<64x32xf32>, vector<8x32xf32> -> vector<8x32xf32>
    %c0_51 = arith.constant 0 : index
    %c0_52 = arith.constant 0 : index
    %126 = vector.load %arg12[%c0_51, %c0_52] : memref<1x32xf32, #tpu.memory_space<vmem>>, vector<1x32xf32>
    %127 = vector.broadcast %126 : vector<1x32xf32> to vector<8x32xf32>
    %128 = arith.addf %125, %127 : vector<8x32xf32>
    %129 = arith.addf %128, %105 : vector<8x32xf32>
    %c0_53 = arith.constant 0 : index
    %c0_54 = arith.constant 0 : index
    %130 = vector.load %arg13[%c0_53, %c0_54] : memref<1x32xf32, #tpu.memory_space<vmem>>, vector<1x32xf32>
    %c0_55 = arith.constant 0 : index
    %c0_56 = arith.constant 0 : index
    %131 = vector.load %arg14[%c0_55, %c0_56] : memref<1x32xf32, #tpu.memory_space<vmem>>, vector<1x32xf32>
    %cst_57 = arith.constant dense<0.000000e+00> : vector<8xf32>
    %132 = vector.multi_reduction <add>, %129, %cst_57 [1] : vector<8x32xf32> to vector<8xf32>
    %133 = vector.shape_cast %132 : vector<8xf32> to vector<8x1xf32>
    %cst_58 = arith.constant 3.200000e+01 : f32
    %134 = vector.broadcast %cst_58 : f32 to vector<8x1xf32>
    %135 = arith.divf %133, %134 : vector<8x1xf32>
    %136 = vector.broadcast %135 : vector<8x1xf32> to vector<8x32xf32>
    %137 = arith.subf %129, %136 : vector<8x32xf32>
    %138 = arith.mulf %137, %137 : vector<8x32xf32>
    %cst_59 = arith.constant dense<0.000000e+00> : vector<8xf32>
    %139 = vector.multi_reduction <add>, %138, %cst_59 [1] : vector<8x32xf32> to vector<8xf32>
    %140 = vector.shape_cast %139 : vector<8xf32> to vector<8x1xf32>
    %cst_60 = arith.constant 3.200000e+01 : f32
    %141 = vector.broadcast %cst_60 : f32 to vector<8x1xf32>
    %142 = arith.divf %140, %141 : vector<8x1xf32>
    %cst_61 = arith.constant 9.99999996E-13 : f32
    %143 = vector.broadcast %cst_61 : f32 to vector<8x1xf32>
    %144 = arith.addf %142, %143 : vector<8x1xf32>
    %145 = math.rsqrt %144 : vector<8x1xf32>
    %146 = vector.broadcast %145 : vector<8x1xf32> to vector<8x32xf32>
    %147 = arith.mulf %137, %146 : vector<8x32xf32>
    %148 = vector.broadcast %130 : vector<1x32xf32> to vector<8x32xf32>
    %149 = arith.mulf %147, %148 : vector<8x32xf32>
    %150 = vector.broadcast %131 : vector<1x32xf32> to vector<8x32xf32>
    %151 = arith.addf %149, %150 : vector<8x32xf32>
    %c0_62 = arith.constant 0 : index
    %c0_63 = arith.constant 0 : index
    %c0_64 = arith.constant 0 : index
    %152 = vector.load %arg15[%c0_62, %c0_63, %c0_64] : memref<1x8x32xf32, #tpu.memory_space<vmem>>, vector<1x8x32xf32>
    %153 = vector.shape_cast %152 : vector<1x8x32xf32> to vector<8x32xf32>
    %154 = vector.shape_cast %151 : vector<8x32xf32> to vector<1x8x32xf32>
    tpu.vector_store %arg15[%c0_62, %c0_63, %c0_64], %154 {strides = array<i32>} : memref<1x8x32xf32, #tpu.memory_space<vmem>>, vector<1x8x32xf32>,
    return
  }
  func.func @transform_0(%arg0: i32) -> (i32, i32, i32) {
    %c0_i32 = arith.constant 0 : i32
    %c0_i32_0 = arith.constant 0 : i32
    %c0_i32_1 = arith.constant 0 : i32
    return %arg0, %c0_i32, %c0_i32_0 : i32, i32, i32
  }
  func.func @transform_1(%arg0: i32) -> (i32, i32, i32) {
    %c0_i32 = arith.constant 0 : i32
    %c0_i32_0 = arith.constant 0 : i32
    %c0_i32_1 = arith.constant 0 : i32
    return %arg0, %c0_i32, %c0_i32_0 : i32, i32, i32
  }
  func.func @transform_2(%arg0: i32) -> (i32, i32) {
    %c0_i32 = arith.constant 0 : i32
    %c0_i32_0 = arith.constant 0 : i32
    %c0_i32_1 = arith.constant 0 : i32
    return %c0_i32, %c0_i32_0 : i32, i32
  }
  func.func @transform_3(%arg0: i32) -> (i32, i32) {
    %c0_i32 = arith.constant 0 : i32
    %c0_i32_0 = arith.constant 0 : i32
    %c0_i32_1 = arith.constant 0 : i32
    return %c0_i32, %c0_i32_0 : i32, i32
  }
  func.func @transform_4(%arg0: i32) -> (i32, i32) {
    %c0_i32 = arith.constant 0 : i32
    %c0_i32_0 = arith.constant 0 : i32
    %c0_i32_1 = arith.constant 0 : i32
    return %c0_i32, %c0_i32_0 : i32, i32
  }
  func.func @transform_5(%arg0: i32) -> (i32, i32) {
    %c0_i32 = arith.constant 0 : i32
    %c0_i32_0 = arith.constant 0 : i32
    %c0_i32_1 = arith.constant 0 : i32
    return %c0_i32, %c0_i32_0 : i32, i32
  }
  func.func @transform_6(%arg0: i32) -> (i32, i32) {
    %c0_i32 = arith.constant 0 : i32
    %c0_i32_0 = arith.constant 0 : i32
    %c0_i32_1 = arith.constant 0 : i32
    return %c0_i32, %c0_i32_0 : i32, i32
  }
  func.func @transform_7(%arg0: i32) -> (i32, i32) {
    %c0_i32 = arith.constant 0 : i32
    %c0_i32_0 = arith.constant 0 : i32
    %c0_i32_1 = arith.constant 0 : i32
    return %c0_i32, %c0_i32_0 : i32, i32
  }
  func.func @transform_8(%arg0: i32) -> (i32, i32) {
    %c0_i32 = arith.constant 0 : i32
    %c0_i32_0 = arith.constant 0 : i32
    %c0_i32_1 = arith.constant 0 : i32
    return %c0_i32, %c0_i32_0 : i32, i32
  }
  func.func @transform_9(%arg0: i32) -> (i32, i32) {
    %c0_i32 = arith.constant 0 : i32
    %c0_i32_0 = arith.constant 0 : i32
    %c0_i32_1 = arith.constant 0 : i32
    return %c0_i32, %c0_i32_0 : i32, i32
  }
  func.func @transform_10(%arg0: i32) -> (i32, i32) {
    %c0_i32 = arith.constant 0 : i32
    %c0_i32_0 = arith.constant 0 : i32
    %c0_i32_1 = arith.constant 0 : i32
    return %c0_i32, %c0_i32_0 : i32, i32
  }
  func.func @transform_11(%arg0: i32) -> (i32, i32) {
    %c0_i32 = arith.constant 0 : i32
    %c0_i32_0 = arith.constant 0 : i32
    %c0_i32_1 = arith.constant 0 : i32
    return %c0_i32, %c0_i32_0 : i32, i32
  }
  func.func @transform_12(%arg0: i32) -> (i32, i32) {
    %c0_i32 = arith.constant 0 : i32
    %c0_i32_0 = arith.constant 0 : i32
    %c0_i32_1 = arith.constant 0 : i32
    return %c0_i32, %c0_i32_0 : i32, i32
  }
  func.func @transform_13(%arg0: i32) -> (i32, i32) {
    %c0_i32 = arith.constant 0 : i32
    %c0_i32_0 = arith.constant 0 : i32
    %c0_i32_1 = arith.constant 0 : i32
    return %c0_i32, %c0_i32_0 : i32, i32
  }
  func.func @transform_14(%arg0: i32) -> (i32, i32, i32) {
    %c0_i32 = arith.constant 0 : i32
    %c0_i32_0 = arith.constant 0 : i32
    %c0_i32_1 = arith.constant 0 : i32
    return %arg0, %c0_i32, %c0_i32_0 : i32, i32, i32
  }
}

</mosaic_0001>

<bundles_post_ra>
// kernel: distilbert_class_forward.7
= control target key start
LH: loop header
LB: loop body
LE: loop exit
PB: predicated region body
PF: predicated region fallthrough
CT: control target
= control target key end

     0   :  { %v270_v1 = vmov 0.0   ;;  %vm271_vm0 = vmmov 0   ;;  %s341_s0 = inlined_call_operand.vmem [shape: f32[2,32], index: 0, kind: input, shape index: {}]   ;;  %s342_s1 = inlined_call_operand.vmem [shape: f32[32,32], index: 1, kind: input, shape index: {}]   ;;  %s343_s2 = inlined_call_operand.vmem [shape: f32[1,32], index: 2, kind: input, shape index: {}]   ;;  %s344_s3 = inlined_call_operand.vmem [shape: f32[32,128], index: 3, kind: input, shape index: {}]   ;;  %s345_s4 = inlined_call_operand.vmem [shape: f32[1,128], index: 4, kind: input, shape index: {}]   ;;  %s346_s5 = inlined_call_operand.hbm [shape: f32[2,128], index: 5, kind: output, shape index: {}]  }
   0x1   :  { %v25_v0 = vld [vmem:[%s342_s1 + $0x18] sm:$0xff]  ;;  %221 = vmatprep.subr.mxu0 %v270_v1  ;;  %v24_v2 = vld [vmem:[%s342_s1 + $0x10] sm:$0xff]  ;;  %229 = vmatprep.mubr.msk.f32.mxu0 %vm271_vm0, %v270_v1 }
   0x2   :  { %222 = vmatpush3.msra.mxu0 %v25_v0  ;;  %232 = vmatprep.subr.mxu1 %v270_v1 }
   0x3   :  { %10 = vsyncpa [#allocation3], 0  ;;  %223 = vmatprep.subr.mxu0 %v270_v1  ;;  %v23_v3 = vld [vmem:[%s342_s1 + $0x8] sm:$0xff]  ;;  %240 = vmatprep.mubr.msk.f32.mxu1 %vm271_vm0, %v270_v1  ;;  %v22_v4 = vld [vmem:[%s342_s1] sm:$0xff]  ;;  %vm33_vm1 = vcmask 261120   ;;  %s272_s13 = smov [#allocation2]  }
   0x4   :  { %224 = vmatpush3.msra.mxu0 %v24_v2  ;;  %v21_v5 = vld [vmem:[%s341_s0] sm:$0x3]  ;;  %v111_v6 = vld [vmem:[%s344_s3 + $0x18] sm:$0xff]  ;;  %v110_v7 = vld [vmem:[%s344_s3 + $0x10] sm:$0xff] }
   0x5   :  { %225 = vmatprep.subr.mxu0 %v270_v1  ;;  %233 = vmatpush3.msra.mxu1 %v111_v6  ;;  %v109_v8 = vld [vmem:[%s344_s3 + $0x8] sm:$0xff]  ;;  %v108_v9 = vld [vmem:[%s344_s3] sm:$0xff]  ;;  %s199_s3 = sshll.u32 %s272_s13, 4  ;;  %s200_s3 = int_to_ptr.vmem [resolvable:$true] %s199_s3 }
   0x6   :  { %226 = vmatpush3.msra.mxu0 %v23_v3  ;;  %234 = vmatprep.subr.mxu1 %v270_v1  ;;  %v207_v10 = vld [vmem:[%s343_s2] ss:$0 sm:$0xff]  ;;  %s248_s14 = scalar_lea.vmem %s200_s3, 32  ;;  %p253_p1 = scmp.lt.s32.totalorder %s200_s3, %s200_s3 }
   0x7   :  { %227 = vmatprep.subr.mxu0 %v270_v1  ;;  %235 = vmatpush3.msra.mxu1 %v110_v7  ;;  %v209_v15 = vld [vmem:[%s345_s4] ss:$0 sm:$0xff]  ;;  %p249_p0 = scmp.ne.s32.totalorder %s200_s3, %s248_s14  ;;  %p254_p2 = scmp.lt.s32.totalorder %s248_s14, %s248_s14 }
   0x8   :  { %228 = vmatpush3.msra.mxu0 %v22_v4  ;;  %236 = vmatprep.subr.mxu1 %v270_v1 }
   0x9   :  { %230 = vmatmul.mubr.msk.f32.vlgmr.msra.gmra.mxu0 %vm33_vm1, %v21_v5  ;;  %237 = vmatpush3.msra.mxu1 %v109_v8  ;;  %p255_p3 = por %p254_p2, %p253_p1 }
   0xa   :  { %238 = vmatprep.subr.mxu1 %v270_v1 }
   0xb   :  { %239 = vmatpush3.msra.mxu1 %v108_v9  ;;  %p256_p4 = pnand %p255_p3, %p249_p0 }
  0xc9   :  { %v103_v11 = vpop.f32.mrf.mxu0 }
  0xca   :  { %v104_v12 = vadd.f32 %v207_v10, %v103_v11 }
  0xcb   :  { %v231_v13 = vpop.f32.mrf.mxu0 }
  0xcc   :  { %246 = vtanh.f32 %v104_v12 }
  0xd9   :  { %v247_v14 = vpop.eup %246 }
  0xda   :  { %241 = vmatmul.mubr.msk.f32.vlgmr.msra.gmra.mxu1 %vm33_vm1, %v247_v14 }
 0x19a   :  { %v188_v16 = vpop.f32.mrf.mxu1 }
 0x19b   :  { %v189_v17 = vadd.f32 %v209_v15, %v188_v16 }
 0x19c   :  { %v242_v18 = vpop.f32.mrf.mxu1 }
 0x19d   :  { %192 = vst [vmem:[#allocation2] sm:$0x3] %v189_v17 }
 0x19e   :  { %259 = shalt.err (!%p256_p4)
}
 0x19f   :  { %202 = dma.vmem_to_hbm [thread:$0]  %s200_s3, 32, %s346_s5, [#allocation3]  }
 0x1a0   :  { %268 = dma.done.wait [#allocation3], 32  }
 0x1a1   :  { %269 = vsyncadd [#allocation3], 4294967264 }
 0x1a2   :  { %206 = vsyncpa [#allocation3], 1 }

// kernel: distilbert_class_forward.4
= control target key start
LH: loop header
LB: loop body
LE: loop exit
PB: predicated region body
PF: predicated region fallthrough
CT: control target
= control target key end

     0   :  { %vm18_vm0 = vcmask 261120   ;;  %s118_s0 = inlined_call_operand.vmem [shape: f32[16,32], index: 0, kind: input, shape index: {}]   ;;  %s119_s1 = inlined_call_operand.vmem [shape: f32[1,32], index: 1, kind: input, shape index: {}]   ;;  %s120_s2 = inlined_call_operand.vmem [shape: f32[1,32], index: 2, kind: input, shape index: {}]   ;;  %s121_s3 = inlined_call_operand.vmem [shape: f32[16,32], index: 3, kind: output, shape index: {}]  }
   0x1   :  { %v14_v0 = vld [vmem:[%s118_s0] sm:$0xff]  ;;  %v15_v1 = vld [vmem:[%s118_s0 + $0x8] sm:$0xff] }
   0x2   :  { %v19_v2 = vsel %vm18_vm0, %v14_v0, 0.0  ;;  %v22_v3 = vsel %vm18_vm0, %v15_v1, 0.0  ;;  %v68_v21 = vld [vmem:[%s119_s1] ss:$0 sm:$0xff] }
   0x3   :  { %20 = vadd.xlane.f32.xlu0 %v19_v2  ;;  %v69_v23 = vld [vmem:[%s120_s2] ss:$0 sm:$0xff] }
   0x7   :  { %23 = vadd.xlane.f32.xlu0 %v22_v3 }
  0x8c   :  { %v21_v4 = vpop.xlane.xlu0 %20 }
  0x8d   :  { %v26_v5 = vmul.f32 0.03125, %v21_v4 }
  0x8f   :  { %v28_v6 = vsub.f32 %v14_v0, %v26_v5 }
  0x90   :  { %v24_v7 = vpop.xlane.xlu0 %23 }
  0x91   :  { %v27_v8 = vmul.f32 0.03125, %v24_v7  ;;  %v30_v9 = vmul.f32 %v28_v6, %v28_v6 }
  0x93   :  { %v29_v10 = vsub.f32 %v15_v1, %v27_v8  ;;  %v32_v11 = vsel %vm18_vm0, %v30_v9, 0.0 }
  0x94   :  { %33 = vadd.xlane.f32.xlu1 %v32_v11 }
  0x95   :  { %v31_v12 = vmul.f32 %v29_v10, %v29_v10 }
  0x97   :  { %v35_v13 = vsel %vm18_vm0, %v31_v12, 0.0 }
  0x98   :  { %36 = vadd.xlane.f32.xlu1 %v35_v13 }
 0x11d   :  { %v34_v14 = vpop.xlane.xlu1 %33 }
 0x11e   :  { %v38_v15 = vmul.f32 0.03125, %v34_v14 }
 0x120   :  { %v40_v16 = vadd.f32 1e-12, %v38_v15 }
 0x121   :  { %v37_v17 = vpop.xlane.xlu1 %36 }
 0x122   :  { %70 = vrsqrt.f32 %v40_v16  ;;  %v39_v18 = vmul.f32 0.03125, %v37_v17 }
 0x124   :  { %v41_v19 = vadd.f32 1e-12, %v39_v18 }
 0x126   :  { %72 = vrsqrt.f32 %v41_v19 }
 0x12f   :  { %v71_v20 = vpop.eup %70 }
 0x130   :  { %v44_v22 = vmul.f32 %v71_v20, %v28_v6 }
 0x132   :  { %v52_v24 = vmul.f32 %v68_v21, %v44_v22 }
 0x133   :  { %v73_v25 = vpop.eup %72 }
 0x134   :  { %v60_v26 = vadd.f32 %v69_v23, %v52_v24  ;;  %v45_v27 = vmul.f32 %v73_v25, %v29_v10 }
 0x136   :  { %62 = vst.msk [vmem:[%s121_s3] sm:$0xff] %vm18_vm0, %v60_v26  ;;  %v53_v28 = vmul.f32 %v68_v21, %v45_v27 }
 0x138   :  { %v61_v29 = vadd.f32 %v69_v23, %v53_v28 }
 0x13a   :  { %63 = vst.msk [vmem:[%s121_s3 + $0x8] sm:$0xff] %vm18_vm0, %v61_v29 }

// kernel: distilbert_class_forward.5
= control target key start
LH: loop header
LB: loop body
LE: loop exit
PB: predicated region body
PF: predicated region fallthrough
CT: control target
= control target key end

     0   :  { %s1948_s29 = smov 0   ;;  %s2159_s0 = inlined_call_operand.vmem [shape: f32[2,8,32], index: 0, kind: input, shape index: {}]   ;;  %s2160_s1 = inlined_call_operand.vmem [shape: f32[2,1,8], index: 1, kind: input, shape index: {}]   ;;  %s2161_s2 = inlined_call_operand.vmem [shape: f32[32,96], index: 2, kind: input, shape index: {}]   ;;  %s2162_s3 = inlined_call_operand.vmem [shape: f32[1,96], index: 3, kind: input, shape index: {}]   ;;  %s2163_s4 = inlined_call_operand.vmem [shape: f32[32,32], index: 4, kind: input, shape index: {}]   ;;  %s2164_s5 = inlined_call_operand.vmem [shape: f32[1,32], index: 5, kind: input, shape index: {}]   ;;  %s2165_s6 = inlined_call_operand.vmem [shape: f32[1,32], index: 6, kind: input, shape index: {}]   ;;  %s2166_s7 = inlined_call_operand.vmem [shape: f32[1,32], index: 7, kind: input, shape index: {}]   ;;  %s2167_s8 = inlined_call_operand.vmem [shape: f32[32,64], index: 8, kind: input, shape index: {}]   ;;  %s2168_s9 = inlined_call_operand.vmem [shape: f32[1,64], index: 9, kind: input, shape index: {}]   ;;  %s2169_s10 = inlined_call_operand.vmem [shape: f32[64,32], index: 10, kind: input, shape index: {}]   ;;  %s2170_s11 = inlined_call_operand.vmem [shape: f32[1,32], index: 11, kind: input, shape index: {}]   ;;  %s2171_s12 = inlined_call_operand.vmem [shape: f32[1,32], index: 12, kind: input, shape index: {}]   ;;  %s2172_s13 = inlined_call_operand.vmem [shape: f32[1,32], index: 13, kind: input, shape index: {}]   ;;  %s2173_s14 = inlined_call_operand.vmem [shape: f32[2,8,32], index: 14, kind: output, shape index: {}]  }
   0x1 LB: > { %s1637_s30 = sadd.s32 4294967295, %s1855_s29   ;;  %p1641_p0 = scmp.ge.s32.totalorder %s1855_s29, 1  ;;  %s1855_s29 = sphi %s1948_s29, %s24_s29  }
   0x2   : > { %p419_p1 = scmp.lt.s32.totalorder %s1855_s29, 3 }
   0x4   : > { %p420_p2 = pnand %p1641_p0, %p419_p1 }
   0x5   : > { %p466_p3 = scmp.lt.s32.totalorder (!%p420_p2), %s1637_s30, 1  ;;  %s1859_s15 = smov (!%p420_p2), 120  }
   0x6   : > { %423 = sbr.rel (%p420_p2) target bundleno = 2442 (0x98a), region = 76  ;;  %s1860_s16 = smov (!%p420_p2), 96  }
   0x7   : > { %s1861_s17 = smov (!%p420_p2), 80   ;;  %s1862_s18 = smov (!%p420_p2), 88  }
   0x8   : > { %s1863_s19 = smov (!%p420_p2), 72   ;;  %s1864_s20 = smov (!%p420_p2), 112  }
   0x9   : > { %s1865_s22 = smov (!%p420_p2), 104   ;;  %s1867_s27 = smov (!%p420_p2), 64  }
   0xa   : > { %s1868_s28 = smov (!%p420_p2), 48  }
   0xb   : > { %v482_v0 = vld [vmem:[%s2161_s2 + $0x18] sm:$0xff]  ;;  %v1857_v1 = vmov 0.0   ;;  %v481_v2 = vld [vmem:[%s2161_s2 + $0x10] sm:$0xff]  ;;  %vm1858_vm0 = vmmov 0   ;;  %s2175_s30 = smov (!%p466_p3, %s1637_s30), 1  ;;  %v480_v3 = vld [vmem:[%s2161_s2 + $0x8] sm:$0xff] }
   0xc   : > { %1711 = vmatprep.subr.mxu1 %v1857_v1  ;;  %1719 = vmatprep.mubr.msk.f32.mxu1 %vm1858_vm0, %v1857_v1  ;;  %s1642_s21 = sshll.u32 %s2175_s30, 3  ;;  %v479_v4 = vld [vmem:[%s2161_s2] sm:$0xff]  ;;  %vm490_vm1 = vcmask 261120   ;;  %vm573_vm2 = vcmask 64512   ;;  %s472_s25 = scalar_lea.vmem %s2160_s1, %s2175_s30  ;;  %vm1243_vm3 = vcmask 130048   ;;  %vm1245_vm4 = vcmask 195584  }
   0xd   : > { %1712 = vmatpush3.msra.mxu1 %v482_v0  ;;  %1732 = vmatprep.subr.mxu0 %v1857_v1  ;;  %s469_s26 = scalar_lea.vmem %s2159_s0, %s1642_s21  ;;  %v1644_v6 = vld [vmem:[%s2162_s3] ss:$0 sm:$0xff]  ;;  %vm1470_vm5 = vcmask 523264  }
   0xe   : > { %1713 = vmatprep.subr.mxu1 %v1857_v1  ;;  %1734 = vmatprep.mubr.msk.f32.mxu0 %vm1858_vm0, %v1857_v1  ;;  %v1984_v5 = vld [vmem:[%s469_s26] sm:$0xff]  ;;  %s1866_s26 = smov 56  }
   0xf   : > { %1714 = vmatpush3.msra.mxu1 %v481_v2  ;;  %v1646_v17 = vld [vmem:[%s472_s25] ss:$0 sm:$0xff] }
  0x10   : > { %1715 = vmatprep.subr.mxu1 %v1857_v1 }
  0x11   : > { %1716 = vmatpush3.msra.mxu1 %v480_v3 }
  0x12   : > { %1717 = vmatprep.subr.mxu1 %v1857_v1 }
  0x13   : > { %1718 = vmatpush3.msra.mxu1 %v479_v4 }
  0x14   : > { %1720 = vmatmul.mubr.msk.f32.vlgmr.msra.gmra.mxu1 %vm490_vm1, %v1984_v5  ;;  %1722 = vmatprep.subr.mxu1 %v1857_v1 }
  0x15   : > { %1724 = vmatprep.mubr.msk.f32.mxu1 %vm1858_vm0, %v1857_v1 }
  0xd4   : > { %v560_v7 = vpop.f32.mrf.mxu1 }
  0xd5   : > { %v1995_v8 = vadd.f32 %v1644_v6, %v560_v7 }
  0xd6   : > { %v1721_v9 = vpop.f32.mrf.mxu1 }
  0xd7   : > { %735 = vrot.lane.b32.xlu1 %v1995_v8, %s1859_s15  ;;  %571 = vrot.lane.b32.xlu0 %v1995_v8, %s1860_s16  ;;  %s1869_s15 = smov 40  }
  0xdb   : > { %902 = vrot.lane.b32.xlu1 %v1995_v8, %s1861_s17  ;;  %737 = vrot.lane.b32.xlu0 %v1995_v8, %s1862_s18  ;;  %s1870_s18 = smov 8  }
  0xdf   : > { %1067 = vrot.lane.b32.xlu1 %v1995_v8, %s1863_s19  ;;  %900 = vrot.lane.b32.xlu0 %v1995_v8, %s1864_s20 }
  0xe3   : > { %1065 = vrot.lane.b32.xlu0 %v1995_v8, %s1865_s22 }
 0x149   : > { %v736_v10 = vpop.permute.xlu1 %735  ;;  %v572_v11 = vpop.permute.xlu0 %571 }
 0x14a   : > { %1723 = vmatpush3.xpose.msk.msra.mxu1 %vm573_vm2, %v572_v11 }
 0x14b   : > { %1727 = vmatprep.subr.mxu1 %v1857_v1 }
 0x14d   : > { %1725 = vmatmul.mubr.msk.f32.vlgmr.msra.gmra.mxu1 %vm573_vm2, %v1995_v8  ;;  %v738_v12 = vpop.permute.xlu0 %737  ;;  %v903_v13 = vpop.permute.xlu1 %902 }
 0x14e   : > { %1733 = vmatpush3.xpose.msk.msra.mxu0 %vm573_vm2, %v738_v12  ;;  %1729 = vmatprep.mubr.msk.f32.mxu1 %vm1858_vm0, %v1857_v1 }
 0x14f   : > { %1742 = vmatprep.subr.mxu0 %v1857_v1 }
 0x151   : > { %1735 = vmatmul.mubr.msk.f32.vlgmr.msra.gmra.mxu0 %vm573_vm2, %v736_v10  ;;  %v901_v14 = vpop.permute.xlu0 %900  ;;  %v1068_v15 = vpop.permute.xlu1 %1067 }
 0x152   : > { %1743 = vmatpush3.xpose.msk.msra.mxu0 %vm573_vm2, %v903_v13  ;;  %1744 = vmatprep.mubr.msk.f32.mxu0 %vm1858_vm0, %v1857_v1  ;;  %v1249_v13 = vld [vmem:[%s2163_s4 + $0x10] sm:$0xff] }
 0x153   : > { %1752 = vmatprep.subr.mxu0 %v1857_v1 }
 0x155   : > { %1745 = vmatmul.mubr.msk.f32.vlgmr.msra.gmra.mxu0 %vm573_vm2, %v901_v14  ;;  %v1066_v16 = vpop.permute.xlu0 %1065  ;;  %v1248_v14 = vld [vmem:[%s2163_s4 + $0x8] sm:$0xff] }
 0x156   : > { %1753 = vmatpush3.xpose.msk.msra.mxu0 %vm573_vm2, %v1068_v15  ;;  %1754 = vmatprep.mubr.msk.f32.mxu0 %vm1858_vm0, %v1857_v1  ;;  %v1247_v15 = vld [vmem:[%s2163_s4] sm:$0xff] }
 0x157   : > { %1762 = vmatprep.subr.mxu0 %v1857_v1 }
 0x159   : > { %1755 = vmatmul.mubr.msk.f32.vlgmr.msra.gmra.mxu0 %vm573_vm2, %v1066_v16 }
 0x15a   : > { %1770 = vmatprep.mubr.msk.f32.mxu0 %vm1858_vm0, %v1857_v1 }
 0x20d   : > { %v644_v18 = vpop.f32.mrf.mxu1 }
 0x20e   : > { %v645_v19 = vadd.f32 %v1646_v17, %v644_v18 }
 0x20f   : > { %v1726_v20 = vpop.f32.mrf.mxu1 }
 0x210   : > { %v648_v21 = vsel %vm573_vm2, %v645_v19, -inf }
 0x211   : > { %v809_v22 = vpop.f32.mrf.mxu0  ;;  %649 = vmax.xlane.f32.xlu1 %v648_v21 }
 0x212   : > { %v810_v23 = vadd.f32 %v1646_v17, %v809_v22 }
 0x213   : > { %v1736_v24 = vpop.f32.mrf.mxu0 }
 0x214   : > { %v813_v25 = vsel %vm573_vm2, %v810_v23, -inf }
 0x215   : > { %814 = vmax.xlane.f32.xlu0 %v813_v25  ;;  %v974_v26 = vpop.f32.mrf.mxu0 }
 0x216   : > { %v975_v27 = vadd.f32 %v1646_v17, %v974_v26  ;;  %v1659_v26 = vld [vmem:[%s2164_s5] ss:$0 sm:$0xff] }
 0x217   : > { %v1746_v28 = vpop.f32.mrf.mxu0 }
 0x218   : > { %v978_v29 = vsel %vm573_vm2, %v975_v27, -inf }
 0x219   : > { %979 = vmax.xlane.f32.xlu0 %v978_v29  ;;  %v1139_v30 = vpop.f32.mrf.mxu0 }
 0x21a   : > { %v1140_v31 = vadd.f32 %v1646_v17, %v1139_v30 }
 0x21b   : > { %v1756_v32 = vpop.f32.mrf.mxu0 }
 0x21c   : > { %v1143_v33 = vsel %vm573_vm2, %v1140_v31, -inf }
 0x21d   : > { %1144 = vmax.xlane.f32.xlu1 %v1143_v33 }
 0x22e   : > { %824 = vrot.lane.b32.xlu1 %v1995_v8, %s1866_s26  ;;  %s1871_s26 = smov 16  }
 0x29a   : > { %v650_v34 = vpop.xlane.xlu1 %649 }
 0x29b   : > { %v651_v35 = vsub.f32 %v645_v19, %v650_v34 }
 0x29d   : > { %v652_v36 = vmul.f32 1.442695, %v651_v35 }
 0x29e   : > { %v815_v37 = vpop.xlane.xlu0 %814 }
 0x29f   : > { %1827 = vpow2.f32 %v652_v36  ;;  %v816_v38 = vsub.f32 %v810_v23, %v815_v37  ;;  %v1365_v37 = vld [vmem:[%s2167_s8 + $0x18] sm:$0xff] }
 0x2a1   : > { %v817_v39 = vmul.f32 1.442695, %v816_v38  ;;  %v1364_v38 = vld [vmem:[%s2167_s8 + $0x10] sm:$0xff] }
 0x2a2   : > { %v980_v49 = vpop.xlane.xlu0 %979 }
 0x2a3   : > { %1829 = vpow2.f32 %v817_v39  ;;  %v981_v50 = vsub.f32 %v975_v27, %v980_v49  ;;  %v1362_v39 = vld [vmem:[%s2167_s8] sm:$0xff]  ;;  %v1462_v49 = vld [vmem:[%s2169_s10 + $0x38] sm:$0xff] }
 0x2a5   : > { %v982_v51 = vmul.f32 1.442695, %v981_v50  ;;  %v1461_v50 = vld [vmem:[%s2169_s10 + $0x30] sm:$0xff] }
 0x2a6   : > { %v1145_v40 = vpop.xlane.xlu1 %1144 }
 0x2a7   : > { %v1146_v41 = vsub.f32 %v1140_v31, %v1145_v40 }
 0x2a9   : > { %v1147_v42 = vmul.f32 1.442695, %v1146_v41 }
 0x2aa   : > { %v825_v54 = vpop.permute.xlu1 %824 }
 0x2ab   : > { %1831 = vpow2.f32 %v1147_v42 }
 0x2ac   : > { %v1828_v43 = vpop.eup %1827  ;;  %1833 = vpow2.f32 %v982_v51  ;;  %v1460_v51 = vld [vmem:[%s2169_s10 + $0x28] sm:$0xff] }
 0x2ad   : > { %v654_v44 = vsel %vm573_vm2, %v1828_v43, 0.0 }
 0x2ae   : > { %655 = vadd.xlane.f32.xlu0 %v654_v44  ;;  %v1661_v44 = vld [vmem:[%s2165_s6] ss:$0 sm:$0xff] }
 0x2b0   : > { %v1830_v45 = vpop.eup %1829 }
 0x2b1   : > { %v819_v46 = vsel %vm573_vm2, %v1830_v45, 0.0 }
 0x2b2   : > { %820 = vadd.xlane.f32.xlu1 %v819_v46  ;;  %v1662_v46 = vld [vmem:[%s2166_s7] ss:$0 sm:$0xff] }
 0x2b8   : > { %v1832_v47 = vpop.eup %1831 }
 0x2b9   : > { %v1149_v48 = vsel %vm573_vm2, %v1832_v47, 0.0  ;;  %v1834_v52 = vpop.eup %1833 }
 0x2ba   : > { %1150 = vadd.xlane.f32.xlu1 %v1149_v48  ;;  %v984_v53 = vsel %vm573_vm2, %v1834_v52, 0.0 }
 0x2c4   : > { %659 = vrot.lane.b32.xlu0 %v1995_v8, %s1867_s27  ;;  %s1872_s27 = smov 24  }
 0x2cb   : > { %989 = vrot.lane.b32.xlu1 %v1995_v8, %s1868_s28 }
 0x2e3   : > { %985 = vadd.xlane.f32.xlu0 %v984_v53  ;;  %v1458_v53 = vld [vmem:[%s2169_s10 + $0x18] sm:$0xff] }
 0x2f9   : > { %1154 = vrot.lane.b32.xlu0 %v1995_v8, %s1869_s15  ;;  %v1250_v8 = vld [vmem:[%s2163_s4 + $0x18] sm:$0xff]  ;;  %s476_s15 = scalar_lea.vmem %s2173_s14, %s1642_s21 }
 0x2fa   : > { %1763 = vmatpush3.msra.mxu0 %v1250_v8 }
 0x2fb   : > { %1764 = vmatprep.subr.mxu0 %v1857_v1 }
 0x2fc   : > { %1765 = vmatpush3.msra.mxu0 %v1249_v13 }
 0x2fd   : > { %1766 = vmatprep.subr.mxu0 %v1857_v1 }
 0x2fe   : > { %1767 = vmatpush3.msra.mxu0 %v1248_v14 }
 0x2ff   : > { %1768 = vmatprep.subr.mxu0 %v1857_v1 }
 0x300   : > { %1769 = vmatpush3.msra.mxu0 %v1247_v15 }
 0x301   : > { %1784 = vmatprep.subr.mxu0 %v1857_v1 }
 0x337   : > { %v656_v55 = vpop.xlane.xlu0 %655 }
 0x338   : > { %1835 = vrcp.f32 %v656_v55  ;;  %v1456_v55 = vld [vmem:[%s2169_s10 + $0x8] sm:$0xff] }
 0x33b   : > { %v660_v56 = vpop.permute.xlu0 %659  ;;  %v821_v57 = vpop.xlane.xlu1 %820 }
 0x33c   : > { %1837 = vrcp.f32 %v821_v57  ;;  %1728 = vmatpush3.msra.mxu1 %v660_v56  ;;  %v1455_v56 = vld [vmem:[%s2169_s10] sm:$0xff] }
 0x33d   : > { %1737 = vmatprep.subr.mxu1 %v1857_v1  ;;  %v1663_v57 = vld [vmem:[%s2168_s9] ss:$0 sm:$0xff] }
 0x343   : > { %v1151_v59 = vpop.xlane.xlu1 %1150 }
 0x345   : > { %v1836_v58 = vpop.eup %1835 }
 0x346   : > { %v658_v60 = vmul.f32 %v1836_v58, %v1828_v43 }
 0x347   : > { %v990_v63 = vpop.permute.xlu1 %989 }
 0x348   : > { %1730 = vmatmul.mubr.msk.f32.vlgmr.msra.gmra.mxu1 %vm573_vm2, %v658_v60 }
 0x349   : > { %v1838_v61 = vpop.eup %1837  ;;  %1738 = vmatpush3.msra.mxu1 %v825_v54  ;;  %1739 = vmatprep.mubr.msk.f32.mxu1 %vm1858_vm0, %v1857_v1  ;;  %v1457_v54 = vld [vmem:[%s2169_s10 + $0x10] sm:$0xff] }
 0x34a   : > { %1747 = vmatprep.subr.mxu1 %v1857_v1  ;;  %v823_v62 = vmul.f32 %v1838_v61, %v1830_v45 }
 0x34c   : > { %1740 = vmatmul.mubr.msk.f32.vlgmr.msra.gmra.mxu1 %vm573_vm2, %v823_v62 }
 0x34d   : > { %1748 = vmatpush3.msra.mxu1 %v990_v63  ;;  %1749 = vmatprep.mubr.msk.f32.mxu1 %vm1858_vm0, %v1857_v1 }
 0x34e   : > { %1757 = vmatprep.subr.mxu1 %v1857_v1 }
 0x36c   : > { %v986_v0 = vpop.xlane.xlu0 %985 }
 0x36d   : > { %1839 = vrcp.f32 %v986_v0 }
 0x36e   : > { %1841 = vrcp.f32 %v1151_v59 }
 0x370   : > { %v1155_v6 = vpop.permute.xlu0 %1154 }
 0x37a   : > { %v1840_v2 = vpop.eup %1839 }
 0x37b   : > { %v988_v3 = vmul.f32 %v1840_v2, %v1834_v52  ;;  %v1842_v4 = vpop.eup %1841  ;;  %v1459_v52 = vld [vmem:[%s2169_s10 + $0x20] sm:$0xff] }
 0x37c   : > { %v1153_v7 = vmul.f32 %v1842_v4, %v1832_v47 }
 0x37d   : > { %1750 = vmatmul.mubr.msk.f32.vlgmr.msra.gmra.mxu1 %vm573_vm2, %v988_v3 }
 0x37e   : > { %1758 = vmatpush3.msra.mxu1 %v1155_v6  ;;  %1759 = vmatprep.mubr.msk.f32.mxu1 %vm1858_vm0, %v1857_v1 }
 0x37f   : > { %1773 = vmatprep.subr.mxu1 %v1857_v1 }
 0x381   : > { %1760 = vmatmul.mubr.msk.f32.vlgmr.msra.gmra.mxu1 %vm573_vm2, %v1153_v7 }
 0x382   : > { %1781 = vmatprep.mubr.msk.f32.mxu1 %vm1858_vm0, %v1857_v1  ;;  %1774 = vmatpush3.msra.mxu1 %v1365_v37 }
 0x383   : > { %1775 = vmatprep.subr.mxu1 %v1857_v1 }
 0x384   : > { %1776 = vmatpush3.msra.mxu1 %v1364_v38 }
 0x385   : > { %1777 = vmatprep.subr.mxu1 %v1857_v1 }
 0x408   : > { %v731_v9 = vpop.f32.mrf.mxu1 }
 0x40a   : > { %v1731_v10 = vpop.f32.mrf.mxu1 }
 0x40c   : > { %v896_v11 = vpop.f32.mrf.mxu1 }
 0x40d   : > { %1231 = vrot.lane.b32.xlu1 %v896_v11, %s1870_s18 }
 0x40e   : > { %v1741_v12 = vpop.f32.mrf.mxu1 }
 0x43d   : > { %v1061_v16 = vpop.f32.mrf.mxu1 }
 0x43e   : > { %1235 = vrot.lane.b32.xlu0 %v1061_v16, %s1871_s26 }
 0x43f   : > { %v1751_v17 = vpop.f32.mrf.mxu1 }
 0x441   : > { %v1226_v18 = vpop.f32.mrf.mxu1 }
 0x442   : > { %1239 = vrot.lane.b32.xlu1 %v1226_v18, %s1872_s27 }
 0x443   : > { %v1761_v19 = vpop.f32.mrf.mxu1 }
 0x47f   : > { %v1232_v20 = vpop.permute.xlu1 %1231 }
 0x480   : > { %v1242_v22 = vsel %vm573_vm2, %v731_v9, %v1232_v20 }
 0x4b0   : > { %v1236_v21 = vpop.permute.xlu0 %1235 }
 0x4b1   : > { %v1244_v23 = vsel %vm1243_vm3, %v1242_v22, %v1236_v21  ;;  %v1667_v22 = vld [vmem:[%s2171_s12] ss:$0 sm:$0xff] }
 0x4b4   : > { %v1240_v24 = vpop.permute.xlu1 %1239 }
 0x4b5   : > { %v1246_v25 = vsel %vm1245_vm4, %v1244_v23, %v1240_v24  ;;  %v1668_v24 = vld [vmem:[%s2172_s13] ss:$0 sm:$0xff] }
 0x4b6   : > { %1771 = vmatmul.mubr.msk.f32.vlgmr.msra.gmra.mxu0 %vm490_vm1, %v1246_v25 }
 0x4b7   : > { %1800 = vmatprep.mubr.msk.f32.mxu0 %vm1858_vm0, %v1857_v1  ;;  %1785 = vmatpush3.msra.mxu0 %v1462_v49 }
 0x4b8   : > { %1786 = vmatprep.subr.mxu0 %v1857_v1 }
 0x4b9   : > { %1787 = vmatpush3.msra.mxu0 %v1461_v50 }
 0x4ba   : > { %1788 = vmatprep.subr.mxu0 %v1857_v1 }
 0x4bb   : > { %1789 = vmatpush3.msra.mxu0 %v1460_v51 }
 0x4bc   : > { %1790 = vmatprep.subr.mxu0 %v1857_v1 }
 0x4bd   : > { %1791 = vmatpush3.msra.mxu0 %v1459_v52 }
 0x4be   : > { %1792 = vmatprep.subr.mxu0 %v1857_v1 }
 0x4bf   : > { %1793 = vmatpush3.msra.mxu0 %v1458_v53 }
 0x4c0   : > { %1794 = vmatprep.subr.mxu0 %v1857_v1 }
 0x4c1   : > { %1795 = vmatpush3.msra.mxu0 %v1457_v54 }
 0x4c2   : > { %1796 = vmatprep.subr.mxu0 %v1857_v1 }
 0x4c3   : > { %1797 = vmatpush3.msra.mxu0 %v1456_v55 }
 0x4c4   : > { %1798 = vmatprep.subr.mxu0 %v1857_v1 }
 0x4c5   : > { %1799 = vmatpush3.msra.mxu0 %v1455_v56 }
 0x576   : > { %v1327_v27 = vpop.f32.mrf.mxu0 }
 0x577   : > { %v1328_v28 = vadd.f32 %v1659_v26, %v1327_v27 }
 0x578   : > { %v1772_v29 = vpop.f32.mrf.mxu0 }
 0x579   : > { %v1331_v30 = vadd.f32 %v1328_v28, %v1984_v5  ;;  %v1363_v5 = vld [vmem:[%s2167_s8 + $0x8] sm:$0xff] }
 0x57a   : > { %1778 = vmatpush3.msra.mxu1 %v1363_v5 }
 0x57b   : > { %v1334_v31 = vsel %vm490_vm1, %v1331_v30, 0.0  ;;  %1779 = vmatprep.subr.mxu1 %v1857_v1  ;;  %v1665_v1 = vld [vmem:[%s2170_s11] ss:$0 sm:$0xff] }
 0x57c   : > { %1335 = vadd.xlane.f32.xlu0 %v1334_v31  ;;  %1780 = vmatpush3.msra.mxu1 %v1362_v39 }
 0x605   : > { %v1336_v32 = vpop.xlane.xlu0 %1335 }
 0x606   : > { %v1338_v33 = vmul.f32 0.03125, %v1336_v32 }
 0x608   : > { %v1339_v34 = vsub.f32 %v1331_v30, %v1338_v33 }
 0x60a   : > { %v1340_v35 = vmul.f32 %v1339_v34, %v1339_v34 }
 0x60c   : > { %v1341_v36 = vsel %vm490_vm1, %v1340_v35, 0.0 }
 0x60d   : > { %1342 = vadd.xlane.f32.xlu1 %v1341_v36 }
 0x696   : > { %v1343_v40 = vpop.xlane.xlu1 %1342 }
 0x697   : > { %v1344_v41 = vmul.f32 0.03125, %v1343_v40 }
 0x699   : > { %v1345_v42 = vadd.f32 1e-12, %v1344_v41 }
 0x69b   : > { %1843 = vrsqrt.f32 %v1345_v42 }
 0x6a8   : > { %v1844_v43 = vpop.eup %1843 }
 0x6a9   : > { %v1347_v45 = vmul.f32 %v1844_v43, %v1339_v34 }
 0x6ab   : > { %v1354_v47 = vmul.f32 %v1661_v44, %v1347_v45 }
 0x6ad   : > { %v1361_v48 = vadd.f32 %v1662_v46, %v1354_v47 }
 0x6af   : > { %1782 = vmatmul.mubr.msk.f32.vlgmr.msra.gmra.mxu1 %vm490_vm1, %v1361_v48 }
 0x76f   : > { %v1442_v58 = vpop.f32.mrf.mxu1 }
 0x770   : > { %v1443_v59 = vadd.f32 %v1663_v57, %v1442_v58 }
 0x771   : > { %v1783_v60 = vpop.f32.mrf.mxu1 }
 0x772   : > { %v1446_v61 = vmul.f32 %v1443_v59, %v1443_v59 }
 0x774   : > { %v1447_v62 = vmul.f32 %v1446_v61, %v1443_v59 }
 0x776   : > { %v1448_v63 = vmul.f32 0.044715, %v1447_v62 }
 0x778   : > { %v1449_v0 = vadd.f32 %v1448_v63, %v1443_v59 }
 0x77a   : > { %v1450_v2 = vmul.f32 0.7978846, %v1449_v0 }
 0x77c   : > { %1845 = vtanh.f32 %v1450_v2 }
 0x789   : > { %v1846_v3 = vpop.eup %1845 }
 0x78a   : > { %v1452_v4 = vadd.f32 1.0, %v1846_v3 }
 0x78c   : > { %v1453_v6 = vmul.f32 0.5, %v1452_v4 }
 0x78e   : > { %v1454_v7 = vmul.f32 %v1453_v6, %v1443_v59 }
 0x790   : > { %1801 = vmatmul.mubr.msk.f32.vlgmr.msra.gmra.mxu0 %vm1470_vm5, %v1454_v7 }
 0x850   : > { %v1540_v8 = vpop.f32.mrf.mxu0 }
 0x851   : > { %v1541_v9 = vadd.f32 %v1665_v1, %v1540_v8 }
 0x852   : > { %v1802_v10 = vpop.f32.mrf.mxu0 }
 0x853   : > { %v1544_v11 = vadd.f32 %v1541_v9, %v1361_v48 }
 0x855   : > { %v1547_v12 = vsel %vm490_vm1, %v1544_v11, 0.0 }
 0x856   : > { %1548 = vadd.xlane.f32.xlu0 %v1547_v12 }
 0x8df   : > { %v1549_v13 = vpop.xlane.xlu0 %1548 }
 0x8e0   : > { %v1550_v14 = vmul.f32 0.03125, %v1549_v13 }
 0x8e2   : > { %v1551_v15 = vsub.f32 %v1544_v11, %v1550_v14 }
 0x8e4   : > { %v1552_v16 = vmul.f32 %v1551_v15, %v1551_v15 }
 0x8e6   : > { %v1553_v17 = vsel %vm490_vm1, %v1552_v16, 0.0 }
 0x8e7   : > { %1554 = vadd.xlane.f32.xlu0 %v1553_v17 }
 0x970   : > { %v1555_v18 = vpop.xlane.xlu0 %1554 }
 0x971   : > { %v1556_v19 = vmul.f32 0.03125, %v1555_v18 }
 0x973   : > { %v1557_v20 = vadd.f32 1e-12, %v1556_v19 }
 0x975   : > { %1847 = vrsqrt.f32 %v1557_v20 }
 0x982   : > { %v1848_v21 = vpop.eup %1847 }
 0x983   : > { %v1559_v23 = vmul.f32 %v1848_v21, %v1551_v15 }
 0x985   : > { %v1566_v25 = vmul.f32 %v1667_v22, %v1559_v23 }
 0x987   : > { %v1573_v26 = vadd.f32 %v1668_v24, %v1566_v25 }
 0x989   : > { %1574 = vst.msk [vmem:[%s476_s15] sm:$0xff] %vm490_vm1, %v1573_v26 }
 0x98a PF: > { %s24_s29 = sadd.s32 1, %s1855_s29  }
 0x98b   : > { %p21_p4 = scmp.ge.s32.totalorder %s24_s29, 4  }
 0x98d   :  { %23 = sbr.rel (!%p21_p4) target bundleno = 1 (0x1), region = 109 }

</bundles_post_ra>
